<compile_context>
chip_gen: v7x
topology: tpu7x:2x2x1
jax: 0.10.0
libtpu: 0.0.40
codegen_flags: <defaults>
</compile_context>

<pallas_src>
import jax
import jax.numpy as jnp
from jax.experimental import pallas as pl
from jax.experimental.pallas import tpu as pltpu


def transition_kernel(x_ref, scale_ref, shift_ref, w_ref, o_ref):
    # x_ref:     (tb, W2, 2*Cin)   rows = (n, h); lanes = [w-even chans | w-odd chans]
    # scale_ref: (1, 1, 2*Cin)     folded BN scale (f32), tiled over the two W halves
    # shift_ref: (1, 1, 2*Cin)     folded BN shift (f32), tiled likewise
    # w_ref:     (Cin, Cout_p)     1x1 conv weight^T, pre-scaled by 0.25 (avg-pool /4)
    # o_ref:     (tb//2, W2, Cout_p)
    tb, w2, two_cin = x_ref.shape
    cin = two_cin // 2
    cout = o_ref.shape[-1]

    # BN + ReLU in f32 (VPU has slack; kernel is DMA-bound).
    z = jnp.maximum(
        x_ref[...].astype(jnp.float32) * scale_ref[...] + shift_ref[...], 0.0)
    # 2x2 average pool as a plain sum (the /4 is folded into w):
    col = z[:, :, :cin] + z[:, :, cin:]           # pair adjacent W columns (lane halves)
    col = col.reshape(tb // 2, 2, w2, cin)        # split leading dim: H-row pairs (free)
    pooled = col[:, 0] + col[:, 1]                # (tb//2, W2, Cin)
    # Merge (tb//2, W2) for a 2-D MXU matmul; relayout-free when W2 % 8 == 0.
    pooled = pooled.reshape((tb // 2) * w2, cin).astype(w_ref.dtype)
    out = jnp.dot(pooled, w_ref[...], preferred_element_type=jnp.float32)
    o_ref[...] = out.reshape(tb // 2, w2, cout).astype(o_ref.dtype)


def _device_budgets():
    """(VMEM capacity bytes, prefer-even-grid?) for the current TPU generation."""
    cap = 64 << 20                      # v7x floor -> safe fallback everywhere
    try:
        cap = int(pltpu.get_tpu_info().vmem_capacity_bytes)
    except Exception:
        pass
    cap = max(32 << 20, min(cap, 128 << 20))
    prefer_even_grid = False
    try:
        # v7x has 2 TensorCores sharing "parallel" grid steps; keep their load even.
        prefer_even_grid = "7" in jax.devices()[0].device_kind.lower()
    except Exception:
        pass
    return cap, prefer_even_grid


def _pick_block_rows(total_rows, bytes_per_row, budget_bytes, prefer_even_grid):
    """Largest even divisor of total_rows whose double-buffered footprint fits
    budget_bytes; on dual-TensorCore parts prefer an even grid length."""
    divisors = [d for d in range(2, total_rows + 1, 2) if total_rows % d == 0]
    fitting = [d for d in divisors if d * bytes_per_row <= budget_bytes] or [2]
    tb = max(fitting)
    if prefer_even_grid:
        even_grid = [d for d in fitting if (total_rows // d) % 2 == 0]
        if even_grid and 2 * max(even_grid) >= tb:   # don't shrink below half of best
            tb = max(even_grid)
    return tb


def transition_block(x_nchw, gamma, beta, conv_w, eps=1e-5,
                     compute_dtype=jnp.bfloat16):
    """Forward pass of TransitionBlock.  x_nchw: (N, Cin, H, W).

    compute_dtype: dtype of the streamed activations and MXU operands.
      bfloat16 (default) halves the dominant HBM read on this bandwidth-bound
      op; pass jnp.float32 for tighter numerics.
    """
    N, Cin, H, W = x_nchw.shape
    Cout = conv_w.shape[0]
    assert H % 2 == 0 and W % 2 == 0, "AvgPool2d(2,2) expects even H and W"
    H2, W2 = H // 2, W // 2
    if compute_dtype is None:
        compute_dtype = jnp.bfloat16
    compute_dtype = jnp.dtype(compute_dtype)

    # ---- BatchNorm2d (training mode) batch statistics -----------------------
    # One fused f32 pass over x (sum and sum-of-squares); biased variance as in
    # PyTorch's normalization path.  f32 accumulation keeps the single-pass
    # E[x^2]-mean^2 form well-conditioned for activation-scale data.
    # TODO(synk): running_mean/running_var momentum updates are a training-time
    # side effect that does not change the forward output; not produced here.
    x32 = x_nchw.astype(jnp.float32)
    cnt = N * H * W
    s1 = jnp.sum(x32, axis=(0, 2, 3))
    s2 = jnp.sum(x32 * x32, axis=(0, 2, 3))
    mean = s1 / cnt
    var = jnp.maximum(s2 / cnt - mean * mean, 0.0)
    scale = gamma.astype(jnp.float32) * jax.lax.rsqrt(var + eps)
    shift = beta.astype(jnp.float32) - mean * scale

    # ---- single channels-last relayout, fused with the bf16 downcast --------
    # One transpose pass over x produces the lane-dense kernel input
    # (rows = (n, h); lanes = [w-even | w-odd] x Cin); all later reshapes are
    # free, and the downcast rides along so the kernel's HBM read is half-width.
    x_r = jnp.transpose(x_nchw, (0, 2, 3, 1))            # (N, H, W, Cin)
    x_r = x_r.reshape(N * H, W2, 2 * Cin).astype(compute_dtype)

    scale2 = jnp.tile(scale, 2).reshape(1, 1, 2 * Cin)
    shift2 = jnp.tile(shift, 2).reshape(1, 1, 2 * Cin)

    # 1x1 conv weight^T with the avg-pool /4 folded in.  Pad Cout to a
    # lane-dense multiple of 128 only when the relative padding cost is small;
    # tiny Cout keeps the narrow store (its HBM traffic is negligible).
    cout_p = ((Cout + 127) // 128) * 128 if Cout >= 64 else Cout
    w = (conv_w.reshape(Cout, Cin).T * 0.25).astype(compute_dtype)
    if cout_p != Cout:
        w = jnp.pad(w, ((0, 0), (0, cout_p - Cout)))

    # ---- generation-aware tiling --------------------------------------------
    vmem_cap, prefer_even_grid = _device_budgets()
    total_rows = N * H
    out_itemsize = jnp.dtype(x_nchw.dtype).itemsize
    bytes_per_row = (2 * W2 * 2 * Cin * x_r.dtype.itemsize   # input, double-buffered
                     + W2 * cout_p * out_itemsize)           # output, 2 x half-row
    tb = _pick_block_rows(total_rows, bytes_per_row, int(vmem_cap * 0.7),
                          prefer_even_grid)
    grid = (total_rows // tb,)

    out = pl.pallas_call(
        transition_kernel,
        out_shape=jax.ShapeDtypeStruct((N * H2, W2, cout_p), x_nchw.dtype),
        grid_spec=pltpu.PrefetchScalarGridSpec(
            num_scalar_prefetch=0,
            grid=grid,
            in_specs=[
                pl.BlockSpec((tb, W2, 2 * Cin), lambda i: (i, 0, 0)),
                pl.BlockSpec((1, 1, 2 * Cin), lambda i: (0, 0, 0)),
                pl.BlockSpec((1, 1, 2 * Cin), lambda i: (0, 0, 0)),
                pl.BlockSpec((Cin, cout_p), lambda i: (0, 0)),
            ],
            out_specs=pl.BlockSpec((tb // 2, W2, cout_p), lambda i: (i, 0, 0)),
        ),
        compiler_params=pltpu.CompilerParams(
            dimension_semantics=("parallel",),
            vmem_limit_bytes=max(32 << 20, int(vmem_cap * 0.85)),
        ),
    )(x_r, scale2, shift2, w)

    # (N*H2, W2, Cout_p) -> NCHW (N, Cout, H2, W2); the output is Cout/(4*Cin)
    # of the input size, so this final transpose is cheap.
    out = out[..., :Cout].reshape(N, H2, W2, Cout)
    return jnp.transpose(out, (0, 3, 1, 2))


def reference(x, gamma, beta, conv_w, eps=1e-5):
    """Pure-JAX reference replicating the PyTorch forward exactly (NCHW, f32)."""
    mean = jnp.mean(x, axis=(0, 2, 3), keepdims=True)
    var = jnp.mean(jnp.square(x - mean), axis=(0, 2, 3), keepdims=True)
    z = (x - mean) / jnp.sqrt(var + eps)
    z = z * gamma[None, :, None, None] + beta[None, :, None, None]
    z = jnp.maximum(z, 0.0)
    w2d = conv_w.reshape(conv_w.shape[0], conv_w.shape[1])
    y = jnp.einsum("nchw,oc->nohw", z, w2d)              # 1x1 conv, no bias
    N, Co, H, W = y.shape
    y = y.reshape(N, Co, H // 2, 2, W // 2, 2).mean(axis=(3, 5))
    return y


if __name__ == "__main__":
    key = jax.random.PRNGKey(0)
    k_x, k_g, k_b, k_w = jax.random.split(key, 4)

    N, Cin, H, W = 2, 8, 16, 16
    Cout = 4

    x = jax.random.normal(k_x, (N, Cin, H, W), dtype=jnp.float32)
    gamma = 1.0 + 0.5 * jax.random.normal(k_g, (Cin,), dtype=jnp.float32)
    beta = 0.1 * jax.random.normal(k_b, (Cin,), dtype=jnp.float32)
    conv_w = (
        jax.random.normal(k_w, (Cout, Cin, 1, 1), dtype=jnp.float32)
        / jnp.sqrt(Cin)
    )

    fwd = jax.jit(transition_block, static_argnames=("eps", "compute_dtype"))
    ref = reference(x, gamma, beta, conv_w)

    # f32 streaming path: tight check against the f32 reference.
    out32 = jax.block_until_ready(
        fwd(x, gamma, beta, conv_w, compute_dtype=jnp.float32))
    assert out32.shape == (N, Cout, H // 2, W // 2), out32.shape
    err32 = float(jnp.max(jnp.abs(out32 - ref)))
    assert err32 < 2e-3, "f32 max abs diff = %g" % err32

    # Default bf16 streaming path: dtype-aware (looser) tolerance.
    out = jax.block_until_ready(fwd(x, gamma, beta, conv_w))
    assert out.shape == (N, Cout, H // 2, W // 2), out.shape
    err = float(jnp.max(jnp.abs(out - ref)))
    assert err < 5e-2, "bf16 max abs diff = %g" % err

    print("KERNEL_OK")
</pallas_src>

<mosaic_0001>
module attributes {stable_mosaic.version = 11 : i64} {
  func.func @transition_kernel(%arg0: i32, %arg1: memref<32x8x16xf32, #tpu.memory_space<vmem>>, %arg2: memref<1x1x16xf32, #tpu.memory_space<vmem>>, %arg3: memref<1x1x16xf32, #tpu.memory_space<vmem>>, %arg4: memref<8x4xf32, #tpu.memory_space<vmem>>, %arg5: memref<16x8x4xf32, #tpu.memory_space<vmem>>) attributes {dimension_semantics = [#tpu.dimension_semantics<parallel>], iteration_bounds = array<i64: 1>, scalar_prefetch = 0 : i64, scratch_operands = 0 : i64, tpu.core_type = #tpu.core_type<tc>, window_params = [{transform_indices = @transform_0, window_bounds = array<i64: 32, 8, 16>}, {pipeline_mode = #tpu.pipeline_mode<synchronous>, transform_indices = @transform_1, window_bounds = array<i64: 1, 1, 16>}, {pipeline_mode = #tpu.pipeline_mode<synchronous>, transform_indices = @transform_2, window_bounds = array<i64: 1, 1, 16>}, {pipeline_mode = #tpu.pipeline_mode<synchronous>, transform_indices = @transform_3, window_bounds = array<i64: 8, 4>}, {transform_indices = @transform_4, window_bounds = array<i64: 16, 8, 4>}]} {
    %c0 = arith.constant 0 : index
    %c0_0 = arith.constant 0 : index
    %c0_1 = arith.constant 0 : index
    %0 = vector.load %arg1[%c0, %c0_0, %c0_1] : memref<32x8x16xf32, #tpu.memory_space<vmem>>, vector<32x8x16xf32>
    %c0_2 = arith.constant 0 : index
    %c0_3 = arith.constant 0 : index
    %c0_4 = arith.constant 0 : index
    %1 = vector.load %arg2[%c0_2, %c0_3, %c0_4] : memref<1x1x16xf32, #tpu.memory_space<vmem>>, vector<1x1x16xf32>
    %2 = vector.broadcast %1 : vector<1x1x16xf32> to vector<32x8x16xf32>
    %3 = arith.mulf %0, %2 : vector<32x8x16xf32>
    %c0_5 = arith.constant 0 : index
    %c0_6 = arith.constant 0 : index
    %c0_7 = arith.constant 0 : index
    %4 = vector.load %arg3[%c0_5, %c0_6, %c0_7] : memref<1x1x16xf32, #tpu.memory_space<vmem>>, vector<1x1x16xf32>
    %5 = vector.broadcast %4 : vector<1x1x16xf32> to vector<32x8x16xf32>
    %6 = arith.addf %3, %5 : vector<32x8x16xf32>
    %cst = arith.constant 0.000000e+00 : f32
    %7 = vector.broadcast %cst : f32 to vector<32x8x16xf32>
    %8 = arith.maximumf %6, %7 : vector<32x8x16xf32>
    %9 = vector.extract_strided_slice %8 {offsets = [0, 0, 0], sizes = [32, 8, 8], strides = [1, 1, 1]} : vector<32x8x16xf32> to vector<32x8x8xf32>
    %10 = vector.extract_strided_slice %8 {offsets = [0, 0, 8], sizes = [32, 8, 8], strides = [1, 1, 1]} : vector<32x8x16xf32> to vector<32x8x8xf32>
    %11 = arith.addf %9, %10 : vector<32x8x8xf32>
    %12 = vector.shape_cast %11 : vector<32x8x8xf32> to vector<16x2x8x8xf32>
    %13 = vector.extract_strided_slice %12 {offsets = [0, 0, 0, 0], sizes = [16, 1, 8, 8], strides = [1, 1, 1, 1]} : vector<16x2x8x8xf32> to vector<16x1x8x8xf32>
    %14 = vector.shape_cast %13 : vector<16x1x8x8xf32> to vector<16x8x8xf32>
    %15 = vector.extract_strided_slice %12 {offsets = [0, 1, 0, 0], sizes = [16, 1, 8, 8], strides = [1, 1, 1, 1]} : vector<16x2x8x8xf32> to vector<16x1x8x8xf32>
    %16 = vector.shape_cast %15 : vector<16x1x8x8xf32> to vector<16x8x8xf32>
    %17 = arith.addf %14, %16 : vector<16x8x8xf32>
    %18 = vector.shape_cast %17 : vector<16x8x8xf32> to vector<128x8xf32>
    %c0_8 = arith.constant 0 : index
    %c0_9 = arith.constant 0 : index
    %19 = vector.load %arg4[%c0_8, %c0_9] : memref<8x4xf32, #tpu.memory_space<vmem>>, vector<8x4xf32>
    %cst_10 = arith.constant dense<0.000000e+00> : vector<128x4xf32>
    %20 = tpu.matmul %18, %19, %cst_10 {dimension_numbers = #tpu.dot_dimension_numbers<[1], [0], [0], [1], [0, 0, 1, 1], [], []>} : vector<128x8xf32>, vector<8x4xf32>, vector<128x4xf32> -> vector<128x4xf32>
    %21 = vector.shape_cast %20 : vector<128x4xf32> to vector<16x8x4xf32>
    %c0_11 = arith.constant 0 : index
    %c0_12 = arith.constant 0 : index
    %c0_13 = arith.constant 0 : index
    %22 = vector.load %arg5[%c0_11, %c0_12, %c0_13] : memref<16x8x4xf32, #tpu.memory_space<vmem>>, vector<16x8x4xf32>
    tpu.vector_store %arg5[%c0_11, %c0_12, %c0_13], %21 {strides = array<i32>} : memref<16x8x4xf32, #tpu.memory_space<vmem>>, vector<16x8x4xf32>,
    return
  }
  func.func @transform_0(%arg0: i32) -> (i32, i32, i32) {
    %c0_i32 = arith.constant 0 : i32
    %c0_i32_0 = arith.constant 0 : i32
    %c0_i32_1 = arith.constant 0 : i32
    return %arg0, %c0_i32, %c0_i32_0 : i32, i32, i32
  }
  func.func @transform_1(%arg0: i32) -> (i32, i32, i32) {
    %c0_i32 = arith.constant 0 : i32
    %c0_i32_0 = arith.constant 0 : i32
    %c0_i32_1 = arith.constant 0 : i32
    %c0_i32_2 = arith.constant 0 : i32
    return %c0_i32, %c0_i32_0, %c0_i32_1 : i32, i32, i32
  }
  func.func @transform_2(%arg0: i32) -> (i32, i32, i32) {
    %c0_i32 = arith.constant 0 : i32
    %c0_i32_0 = arith.constant 0 : i32
    %c0_i32_1 = arith.constant 0 : i32
    %c0_i32_2 = arith.constant 0 : i32
    return %c0_i32, %c0_i32_0, %c0_i32_1 : i32, i32, i32
  }
  func.func @transform_3(%arg0: i32) -> (i32, i32) {
    %c0_i32 = arith.constant 0 : i32
    %c0_i32_0 = arith.constant 0 : i32
    %c0_i32_1 = arith.constant 0 : i32
    return %c0_i32, %c0_i32_0 : i32, i32
  }
  func.func @transform_4(%arg0: i32) -> (i32, i32, i32) {
    %c0_i32 = arith.constant 0 : i32
    %c0_i32_0 = arith.constant 0 : i32
    %c0_i32_1 = arith.constant 0 : i32
    return %arg0, %c0_i32, %c0_i32_0 : i32, i32, i32
  }
}

</mosaic_0001>

<bundles_post_ra>
// kernel: tile.19
= control target key start
LH: loop header
LB: loop body
LE: loop exit
PB: predicated region body
PF: predicated region fallthrough
CT: control target
= control target key end

     0   :  { %vm7_vm0 = vcmask 64512   ;;  %vm13_vm1 = vcmask 130112   ;;  %s39_s0 = inlined_call_operand.vmem [shape: f32[2,8], index: 0, kind: input, shape index: {}]   ;;  %s40_s1 = inlined_call_operand.vmem [shape: f32[1,1,16], index: 1, kind: output, shape index: {}]  }
   0x1   :  { %v4_v0 = vld [vmem:[%s39_s0] sm:$0x3]  ;;  %s22_s0 = smov 8  }
   0x2   :  { %5 = vst [vmem:[#allocation1] sm:$0x3] %v4_v0 }
   0x9   :  { %v10_v1 = vld [vmem:[#allocation1 + $0x1] sm:$0x1]   ;;  %v6_v2 = vld [vmem:[#allocation1] sm:$0x1]  }
   0xa   :  { %11 = vrot.lane.b32.xlu0 %v10_v1, %s22_s0  ;;  %8 = vst.msk [vmem:[#allocation0] sm:$0x1] %vm7_vm0, %v6_v2  }
  0x7c   :  { %v12_v3 = vpop.permute.xlu0 %11  }
  0x7d   :  { %14 = vst.msk [vmem:[#allocation0] sm:$0x1] %vm13_vm1, %v12_v3  }
  0x84   :  { %v18_v4 = vld [vmem:[#allocation0] sm:$0x1] }
  0x85   :  { %20 = vst [vmem:[%s40_s1] sm:$0x1] %v18_v4 }

// kernel: tile.18
= control target key start
LH: loop header
LB: loop body
LE: loop exit
PB: predicated region body
PF: predicated region fallthrough
CT: control target
= control target key end

     0   :  { %s22_s0 = inlined_call_operand.vmem [shape: f32[8], index: 0, kind: input, shape index: {}]   ;;  %s23_s1 = inlined_call_operand.vmem [shape: f32[2,8], index: 1, kind: output, shape index: {}]  }
   0x1   :  { %v4_v0 = vld [vmem:[%s22_s0] ss:$0 sm:$0xff] }
   0x2   :  { %5 = vst [vmem:[%s23_s1] sm:$0x3] %v4_v0 }

// kernel: transition_block.1
= control target key start
LH: loop header
LB: loop body
LE: loop exit
PB: predicated region body
PF: predicated region fallthrough
CT: control target
= control target key end

     0   :  { %s615_s7 = smov 120   ;;  %vm336_vm0 = vcmask 64512   ;;  %vm530_vm1 = vcmask 31744   ;;  %s1150_s0 = inlined_call_operand.vmem [shape: f32[32,8,16], index: 0, kind: input, shape index: {}]   ;;  %s1151_s1 = inlined_call_operand.vmem [shape: f32[1,1,16], index: 1, kind: input, shape index: {}]   ;;  %s1152_s2 = inlined_call_operand.vmem [shape: f32[1,1,16], index: 2, kind: input, shape index: {}]   ;;  %s1153_s3 = inlined_call_operand.vmem [shape: f32[8,4], index: 3, kind: input, shape index: {}]   ;;  %s1154_s4 = inlined_call_operand.vmem [shape: f32[16,8,4], index: 4, kind: output, shape index: {}]  }
   0x1   :  { %v33_v0 = vld [vmem:[%s1150_s0 + $0x80] sm:$0xff]  ;;  %v34_v5 = vld [vmem:[%s1150_s0 + $0x88] sm:$0xff]  ;;  %v20_v10 = vld [vmem:[%s1150_s0 + $0x18] sm:$0xff] }
   0x2   :  { %v647_v1 = vld [vmem:[%s1151_s1] ss:$0 sm:$0xff]  ;;  %v18_v6 = vld [vmem:[%s1150_s0 + $0x8] sm:$0xff]  ;;  %v19_v11 = vld [vmem:[%s1150_s0 + $0x10] sm:$0xff] }
   0x3   :  { %v652_v2 = vld [vmem:[%s1152_s2] ss:$0 sm:$0xff]  ;;  %v72_v3 = vmul.f32 %v647_v1, %v33_v0  ;;  %v73_v8 = vmul.f32 %v647_v1, %v34_v5  ;;  %v57_v9 = vmul.f32 %v647_v1, %v18_v6  ;;  %v59_v13 = vmul.f32 %v647_v1, %v20_v10  ;;  %v36_v18 = vld [vmem:[%s1150_s0 + $0x98] sm:$0xff]  ;;  %v35_v20 = vld [vmem:[%s1150_s0 + $0x90] sm:$0xff] }
   0x4   :  { %v17_v4 = vld [vmem:[%s1150_s0] sm:$0xff]  ;;  %v58_v17 = vmul.f32 %v647_v1, %v19_v11  ;;  %v75_v24 = vmul.f32 %v647_v1, %v36_v18  ;;  %v74_v27 = vmul.f32 %v647_v1, %v35_v20  ;;  %v22_v28 = vld [vmem:[%s1150_s0 + $0x28] sm:$0xff]  ;;  %v24_v45 = vld [vmem:[%s1150_s0 + $0x38] sm:$0xff] }
   0x5   :  { %v56_v7 = vmul.f32 %v647_v1, %v17_v4  ;;  %v674_v12 = vadd.f32 %v652_v2, %v72_v3  ;;  %v681_v15 = vadd.f32 %v652_v2, %v73_v8  ;;  %v684_v16 = vadd.f32 %v652_v2, %v57_v9  ;;  %v21_v29 = vld [vmem:[%s1150_s0 + $0x20] sm:$0xff]  ;;  %v38_v37 = vld [vmem:[%s1150_s0 + $0xa8] sm:$0xff]  ;;  %v23_v46 = vld [vmem:[%s1150_s0 + $0x30] sm:$0xff] }
   0x6   :  { %v700_v23 = vadd.f32 %v652_v2, %v59_v13  ;;  %v708_v26 = vadd.f32 %v652_v2, %v58_v17  ;;  %v722_v31 = vadd.f32 %v652_v2, %v75_v24  ;;  %v61_v32 = vmul.f32 %v647_v1, %v22_v28  ;;  %v335_v33 = vld [vmem:[%s1153_s3] sm:$0xff]  ;;  %v40_v53 = vld [vmem:[%s1150_s0 + $0xb8] sm:$0xff]  ;;  %v39_v54 = vld [vmem:[%s1150_s0 + $0xb0] sm:$0xff] }
   0x7   :  { %v678_v14 = vadd.f32 %v652_v2, %v56_v7  ;;  %v143_v19 = vmax.f32 %v674_v12, 0.0  ;;  %v144_v22 = vmax.f32 %v681_v15, 0.0  ;;  %v128_v25 = vmax.f32 %v684_v16, 0.0  ;;  %586 = vmatprep.subr.mxu0 %v335_v33  ;;  %v37_v38 = vld [vmem:[%s1150_s0 + $0xa0] sm:$0xff]  ;;  %612 = vmatprep.subr.mxu1 %v335_v33  ;;  %v26_v61 = vld [vmem:[%s1150_s0 + $0x48] sm:$0xff]  ;;  %v28_v20 = vld [vmem:[%s1150_s0 + $0x58] sm:$0xff] }
   0x8   :  { %v130_v30 = vmax.f32 %v700_v23, 0.0  ;;  %v129_v34 = vmax.f32 %v708_v26, 0.0  ;;  %v733_v35 = vadd.f32 %v652_v2, %v74_v27  ;;  %v60_v36 = vmul.f32 %v647_v1, %v21_v29  ;;  %587 = vmatpush3.msra.mxu0 %v335_v33  ;;  %613 = vmatpush3.msra.mxu1 %v335_v33  ;;  %v25_v62 = vld [vmem:[%s1150_s0 + $0x40] sm:$0xff]  ;;  %v42_v7 = vld [vmem:[%s1150_s0 + $0xc8] sm:$0xff]  ;;  %v27_v24 = vld [vmem:[%s1150_s0 + $0x50] sm:$0xff] }
   0x9   :  { %v127_v21 = vmax.f32 %v678_v14, 0.0  ;;  %223 = vrot.lane.b32.xlu1 %v143_v19, %s615_s7  ;;  %v146_v39 = vmax.f32 %v722_v31, 0.0  ;;  %v747_v40 = vadd.f32 %v652_v2, %v61_v32  ;;  %v77_v41 = vmul.f32 %v647_v1, %v38_v37  ;;  %v41_v8 = vld [vmem:[%s1150_s0 + $0xc0] sm:$0xff]  ;;  %v44_v37 = vld [vmem:[%s1150_s0 + $0xd8] sm:$0xff] }
   0xa   :  { %v145_v42 = vmax.f32 %v733_v35, 0.0  ;;  %v755_v43 = vadd.f32 %v652_v2, %v60_v36  ;;  %v76_v44 = vmul.f32 %v647_v1, %v37_v38  ;;  %v63_v49 = vmul.f32 %v647_v1, %v24_v45  ;;  %v43_v38 = vld [vmem:[%s1150_s0 + $0xd0] sm:$0xff] }
   0xb   :  { %191 = vrot.lane.b32.xlu0 %v127_v21, %s615_s7  ;;  %v132_v47 = vmax.f32 %v747_v40, 0.0  ;;  %v769_v48 = vadd.f32 %v652_v2, %v77_v41  ;;  %v62_v52 = vmul.f32 %v647_v1, %v23_v46  ;;  %v79_v57 = vmul.f32 %v647_v1, %v40_v53  ;;  %v30_v53 = vld [vmem:[%s1150_s0 + $0x68] sm:$0xff] }
   0xc   :  { %v131_v50 = vmax.f32 %v755_v43, 0.0  ;;  %v777_v51 = vadd.f32 %v652_v2, %v76_v44  ;;  %v791_v56 = vadd.f32 %v652_v2, %v63_v49  ;;  %v78_v60 = vmul.f32 %v647_v1, %v39_v54  ;;  %v29_v54 = vld [vmem:[%s1150_s0 + $0x60] sm:$0xff] }
   0xd   :  { %225 = vrot.lane.b32.xlu1 %v144_v22, %s615_s7  ;;  %v148_v55 = vmax.f32 %v769_v48, 0.0  ;;  %v799_v59 = vadd.f32 %v652_v2, %v62_v52  ;;  %v813_v0 = vadd.f32 %v652_v2, %v79_v57  ;;  %v65_v3 = vmul.f32 %v647_v1, %v26_v61 }
   0xe   :  { %v147_v58 = vmax.f32 %v777_v51, 0.0  ;;  %v134_v63 = vmax.f32 %v791_v56, 0.0  ;;  %v821_v5 = vadd.f32 %v652_v2, %v78_v60  ;;  %v64_v6 = vmul.f32 %v647_v1, %v25_v62 }
   0xf   :  { %193 = vrot.lane.b32.xlu0 %v128_v25, %s615_s7  ;;  %v133_v4 = vmax.f32 %v799_v59, 0.0  ;;  %v150_v9 = vmax.f32 %v813_v0, 0.0  ;;  %v835_v10 = vadd.f32 %v652_v2, %v65_v3  ;;  %v81_v11 = vmul.f32 %v647_v1, %v42_v7  ;;  %v46_v7 = vld [vmem:[%s1150_s0 + $0xe8] sm:$0xff] }
  0x10   :  { %v149_v13 = vmax.f32 %v821_v5, 0.0  ;;  %v843_v17 = vadd.f32 %v652_v2, %v64_v6  ;;  %v80_v18 = vmul.f32 %v647_v1, %v41_v8  ;;  %v67_v29 = vmul.f32 %v647_v1, %v28_v20  ;;  %v45_v8 = vld [vmem:[%s1150_s0 + $0xe0] sm:$0xff] }
  0x11   :  { %197 = vrot.lane.b32.xlu1 %v130_v30, %s615_s7  ;;  %v136_v27 = vmax.f32 %v835_v10, 0.0  ;;  %v857_v28 = vadd.f32 %v652_v2, %v81_v11  ;;  %v66_v36 = vmul.f32 %v647_v1, %v27_v24  ;;  %v83_v45 = vmul.f32 %v647_v1, %v44_v37  ;;  %v32_v37 = vld [vmem:[%s1150_s0 + $0x78] sm:$0xff] }
  0x12   :  { %v135_v32 = vmax.f32 %v843_v17, 0.0  ;;  %v865_v33 = vadd.f32 %v652_v2, %v80_v18  ;;  %v879_v44 = vadd.f32 %v652_v2, %v67_v29  ;;  %v82_v52 = vmul.f32 %v647_v1, %v43_v38  ;;  %v31_v38 = vld [vmem:[%s1150_s0 + $0x70] sm:$0xff] }
  0x13   :  { %195 = vrot.lane.b32.xlu0 %v129_v34, %s615_s7  ;;  %v152_v41 = vmax.f32 %v857_v28, 0.0  ;;  %v887_v49 = vadd.f32 %v652_v2, %v66_v36  ;;  %v901_v60 = vadd.f32 %v652_v2, %v83_v45  ;;  %v69_v61 = vmul.f32 %v647_v1, %v30_v53 }
  0x14   :  { %v1167_v46 = vmax.f32 %v865_v33, 0.0  ;;  %v1166_v57 = vmax.f32 %v879_v44, 0.0  ;;  %v909_v3 = vadd.f32 %v652_v2, %v82_v52  ;;  %v68_v6 = vmul.f32 %v647_v1, %v29_v54 }
  0x15   :  { %229 = vrot.lane.b32.xlu1 %v146_v39, %s615_s7  ;;  %v1164_v62 = vmax.f32 %v887_v49, 0.0  ;;  %v1156_v11 = vmax.f32 %v901_v60, 0.0  ;;  %v923_v18 = vadd.f32 %v652_v2, %v69_v61  ;;  %v85_v20 = vmul.f32 %v647_v1, %v46_v7  ;;  %v48_v7 = vld [vmem:[%s1150_s0 + $0xf8] sm:$0xff] }
  0x16   :  { %v1155_v24 = vmax.f32 %v909_v3, 0.0  ;;  %v931_v29 = vadd.f32 %v652_v2, %v68_v6  ;;  %v84_v36 = vmul.f32 %v647_v1, %v45_v8  ;;  %v71_v53 = vmul.f32 %v647_v1, %v32_v37  ;;  %v47_v8 = vld [vmem:[%s1150_s0 + $0xf0] sm:$0xff] }
  0x17   :  { %227 = vrot.lane.b32.xlu0 %v145_v42, %s615_s7  ;;  %v1157_v45 = vmax.f32 %v923_v18, 0.0  ;;  %v945_v52 = vadd.f32 %v652_v2, %v85_v20  ;;  %v70_v6 = vmul.f32 %v647_v1, %v31_v38 }
  0x18   :  { %v1163_v54 = vmax.f32 %v931_v29, 0.0  ;;  %v953_v61 = vadd.f32 %v652_v2, %v84_v36  ;;  %v967_v37 = vadd.f32 %v652_v2, %v71_v53  ;;  %v87_v36 = vmul.f32 %v647_v1, %v48_v7 }
  0x19   :  { %201 = vrot.lane.b32.xlu1 %v132_v47, %s615_s7  ;;  %v1161_v20 = vmax.f32 %v945_v52, 0.0 }
  0x1a   :  { %v1159_v38 = vmax.f32 %v953_v61, 0.0  ;;  %v1158_v53 = vmax.f32 %v967_v37, 0.0 }
  0x1b   :  { %199 = vrot.lane.b32.xlu0 %v131_v50, %s615_s7 }
  0x1d   :  { %233 = vrot.lane.b32.xlu1 %v148_v55, %s615_s7 }
  0x1f   :  { %231 = vrot.lane.b32.xlu0 %v147_v58, %s615_s7 }
  0x21   :  { %205 = vrot.lane.b32.xlu1 %v134_v63, %s615_s7 }
  0x23   :  { %203 = vrot.lane.b32.xlu0 %v133_v4, %s615_s7 }
  0x25   :  { %237 = vrot.lane.b32.xlu1 %v150_v9, %s615_s7 }
  0x27   :  { %235 = vrot.lane.b32.xlu0 %v149_v13, %s615_s7 }
  0x29   :  { %209 = vrot.lane.b32.xlu1 %v136_v27, %s615_s7 }
  0x2b   :  { %207 = vrot.lane.b32.xlu0 %v135_v32, %s615_s7 }
  0x2d   :  { %241 = vrot.lane.b32.xlu1 %v152_v41, %s615_s7 }
  0x2f   :  { %239 = vrot.lane.b32.xlu0 %v1167_v46, %s615_s7 }
  0x31   :  { %213 = vrot.lane.b32.xlu1 %v1166_v57, %s615_s7 }
  0x33   :  { %211 = vrot.lane.b32.xlu0 %v1164_v62, %s615_s7 }
  0x35   :  { %245 = vrot.lane.b32.xlu1 %v1156_v11, %s615_s7  ;;  %v86_v11 = vmul.f32 %v647_v1, %v47_v8 }
  0x37   :  { %243 = vrot.lane.b32.xlu0 %v1155_v24, %s615_s7  ;;  %v975_v24 = vadd.f32 %v652_v2, %v70_v6  ;;  %v990_v6 = vadd.f32 %v652_v2, %v86_v11 }
  0x39   :  { %217 = vrot.lane.b32.xlu1 %v1157_v45, %s615_s7  ;;  %v983_v45 = vadd.f32 %v652_v2, %v87_v36  ;;  %v1160_v7 = vmax.f32 %v975_v24, 0.0  ;;  %v1165_v8 = vmax.f32 %v990_v6, 0.0 }
  0x3b   :  { %215 = vrot.lane.b32.xlu0 %v1163_v54, %s615_s7  ;;  %v1162_v1 = vmax.f32 %v983_v45, 0.0 }
  0x3d   :  { %249 = vrot.lane.b32.xlu1 %v1161_v20, %s615_s7 }
  0x3f   :  { %247 = vrot.lane.b32.xlu0 %v1159_v38, %s615_s7 }
  0x41   :  { %221 = vrot.lane.b32.xlu1 %v1158_v53, %s615_s7 }
  0x43   :  { %219 = vrot.lane.b32.xlu0 %v1160_v7, %s615_s7 }
  0x45   :  { %253 = vrot.lane.b32.xlu1 %v1162_v1, %s615_s7 }
  0x47   :  { %251 = vrot.lane.b32.xlu0 %v1165_v8, %s615_s7 }
  0x7b   :  { %v224_v2 = vpop.permute.xlu1 %223 }
  0x7c   :  { %v303_v53 = vadd.f32 %v224_v2, %v143_v19  ;;  %v1172_v2 = vmax.f32 %v909_v3, 0.0 }
  0x7d   :  { %v192_v11 = vpop.permute.xlu0 %191 }
  0x7e   :  { %v287_v20 = vadd.f32 %v192_v11, %v127_v21 }
  0x7f   :  { %v226_v36 = vpop.permute.xlu1 %225 }
  0x80   :  { %v304_v38 = vadd.f32 %v226_v36, %v144_v22 }
  0x81   :  { %v194_v7 = vpop.permute.xlu0 %193 }
  0x82   :  { %v288_v1 = vadd.f32 %v194_v7, %v128_v25  ;;  %v327_v54 = vadd.f32 %v304_v38, %v303_v53 }
  0x83   :  { %v198_v62 = vpop.permute.xlu1 %197 }
  0x84   :  { %v319_v8 = vadd.f32 %v288_v1, %v287_v20  ;;  %v290_v57 = vadd.f32 %v198_v62, %v130_v30  ;;  %600 = vmatprep.mubr.msk.f32.mxu1 %vm336_vm0, %v327_v54 }
  0x85   :  { %v196_v46 = vpop.permute.xlu0 %195 }
  0x86   :  { %v289_v12 = vadd.f32 %v196_v46, %v129_v34  ;;  %588 = vmatprep.mubr.msk.f32.mxu0 %vm336_vm0, %v319_v8 }
  0x87   :  { %v230_v15 = vpop.permute.xlu1 %229 }
  0x88   :  { %v320_v14 = vadd.f32 %v290_v57, %v289_v12  ;;  %v306_v16 = vadd.f32 %v230_v15, %v146_v39  ;;  %v1173_v12 = vmax.f32 %v923_v18, 0.0  ;;  %v1174_v15 = vmax.f32 %v931_v29, 0.0 }
  0x89   :  { %v228_v19 = vpop.permute.xlu0 %227 }
  0x8a   :  { %v305_v21 = vadd.f32 %v228_v19, %v145_v42  ;;  %589 = vmatmul.mubr.msk.f32.vlgmr.msra.gmra.mrb[0].mxu0 %vm336_vm0, %v320_v14 }
  0x8b   :  { %v202_v23 = vpop.permute.xlu1 %201 }
  0x8c   :  { %v328_v22 = vadd.f32 %v306_v16, %v305_v21  ;;  %v292_v25 = vadd.f32 %v202_v23, %v132_v47  ;;  %v1175_v21 = vmax.f32 %v945_v52, 0.0  ;;  %v1176_v23 = vmax.f32 %v953_v61, 0.0 }
  0x8d   :  { %v200_v26 = vpop.permute.xlu0 %199 }
  0x8e   :  { %v291_v30 = vadd.f32 %v200_v26, %v131_v50  ;;  %601 = vmatmul.mubr.msk.f32.vlgmr.msra.gmra.mrb[0].mxu1 %vm336_vm0, %v328_v22 }
  0x8f   :  { %v234_v31 = vpop.permute.xlu1 %233 }
  0x90   :  { %v321_v34 = vadd.f32 %v292_v25, %v291_v30  ;;  %v308_v39 = vadd.f32 %v234_v31, %v148_v55  ;;  %v1177_v30 = vmax.f32 %v967_v37, 0.0  ;;  %v1178_v31 = vmax.f32 %v975_v24, 0.0 }
  0x91   :  { %v232_v35 = vpop.permute.xlu0 %231 }
  0x92   :  { %v307_v42 = vadd.f32 %v232_v35, %v147_v58  ;;  %591 = vmatprep.mubr.msk.f32.mxu0 %vm336_vm0, %v321_v34 }
  0x93   :  { %v206_v40 = vpop.permute.xlu1 %205 }
  0x94   :  { %v329_v46 = vadd.f32 %v308_v39, %v307_v42  ;;  %v294_v47 = vadd.f32 %v206_v40, %v134_v63  ;;  %v1179_v42 = vmax.f32 %v983_v45, 0.0  ;;  %v1180_v40 = vmax.f32 %v990_v6, 0.0 }
  0x95   :  { %v204_v43 = vpop.permute.xlu0 %203 }
  0x96   :  { %v293_v50 = vadd.f32 %v204_v43, %v133_v4  ;;  %603 = vmatprep.mubr.msk.f32.mxu1 %vm336_vm0, %v329_v46 }
  0x97   :  { %v238_v48 = vpop.permute.xlu1 %237 }
  0x98   :  { %v322_v57 = vadd.f32 %v294_v47, %v293_v50  ;;  %v310_v55 = vadd.f32 %v238_v48, %v150_v9 }
  0x99   :  { %v236_v51 = vpop.permute.xlu0 %235 }
  0x9a   :  { %v309_v58 = vadd.f32 %v236_v51, %v149_v13  ;;  %592 = vmatmul.mubr.msk.f32.gmra.mrb[2].mxu0 %vm336_vm0, %v322_v57  ;;  %v1168_v13 = vmax.f32 %v865_v33, 0.0 }
  0x9b   :  { %v210_v56 = vpop.permute.xlu1 %209 }
  0x9c   :  { %v330_v62 = vadd.f32 %v310_v55, %v309_v58  ;;  %v296_v63 = vadd.f32 %v210_v56, %v136_v27  ;;  %v1169_v27 = vmax.f32 %v879_v44, 0.0 }
  0x9d   :  { %v208_v59 = vpop.permute.xlu0 %207 }
  0x9e   :  { %v295_v4 = vadd.f32 %v208_v59, %v135_v32  ;;  %604 = vmatmul.mubr.msk.f32.gmra.mrb[2].mxu1 %vm336_vm0, %v330_v62  ;;  %v1170_v32 = vmax.f32 %v887_v49, 0.0 }
  0x9f   :  { %v242_v0 = vpop.permute.xlu1 %241 }
  0xa0   :  { %v323_v54 = vadd.f32 %v296_v63, %v295_v4  ;;  %v312_v9 = vadd.f32 %v242_v0, %v152_v41  ;;  %v1171_v41 = vmax.f32 %v901_v60, 0.0 }
  0xa1   :  { %v240_v5 = vpop.permute.xlu0 %239 }
  0xa2   :  { %v311_v20 = vadd.f32 %v240_v5, %v1168_v13  ;;  %594 = vmatprep.mubr.msk.f32.mxu0 %vm336_vm0, %v323_v54 }
  0xa3   :  { %v214_v10 = vpop.permute.xlu1 %213 }
  0xa4   :  { %v331_v38 = vadd.f32 %v312_v9, %v311_v20  ;;  %v298_v53 = vadd.f32 %v214_v10, %v1169_v27 }
  0xa5   :  { %v212_v17 = vpop.permute.xlu0 %211 }
  0xa6   :  { %v297_v7 = vadd.f32 %v212_v17, %v1170_v32  ;;  %606 = vmatprep.mubr.msk.f32.mxu1 %vm336_vm0, %v331_v38 }
  0xa7   :  { %v246_v28 = vpop.permute.xlu1 %245 }
  0xa8   :  { %v324_v1 = vadd.f32 %v298_v53, %v297_v7  ;;  %v314_v8 = vadd.f32 %v246_v28, %v1171_v41 }
  0xa9   :  { %v244_v33 = vpop.permute.xlu0 %243 }
  0xaa   :  { %v313_v11 = vadd.f32 %v244_v33, %v1172_v2  ;;  %595 = vmatmul.mubr.msk.f32.gmra.mrb[4].mxu0 %vm336_vm0, %v324_v1 }
  0xab   :  { %v218_v44 = vpop.permute.xlu1 %217 }
  0xac   :  { %v332_v36 = vadd.f32 %v314_v8, %v313_v11  ;;  %v300_v14 = vadd.f32 %v218_v44, %v1173_v12 }
  0xad   :  { %v216_v49 = vpop.permute.xlu0 %215 }
  0xae   :  { %v299_v16 = vadd.f32 %v216_v49, %v1174_v15  ;;  %607 = vmatmul.mubr.msk.f32.gmra.mrb[4].mxu1 %vm336_vm0, %v332_v36 }
  0xaf   :  { %v250_v60 = vpop.permute.xlu1 %249 }
  0xb0   :  { %v325_v19 = vadd.f32 %v300_v14, %v299_v16  ;;  %v316_v22 = vadd.f32 %v250_v60, %v1175_v21 }
  0xb1   :  { %v248_v3 = vpop.permute.xlu0 %247 }
  0xb2   :  { %v315_v25 = vadd.f32 %v248_v3, %v1176_v23  ;;  %597 = vmatprep.mubr.msk.f32.mxu0 %vm336_vm0, %v325_v19 }
  0xb3   :  { %v222_v18 = vpop.permute.xlu1 %221 }
  0xb4   :  { %v333_v26 = vadd.f32 %v316_v22, %v315_v25  ;;  %v302_v34 = vadd.f32 %v222_v18, %v1177_v30 }
  0xb5   :  { %v220_v29 = vpop.permute.xlu0 %219 }
  0xb6   :  { %v301_v39 = vadd.f32 %v220_v29, %v1178_v31  ;;  %609 = vmatprep.mubr.msk.f32.mxu1 %vm336_vm0, %v333_v26 }
  0xb7   :  { %v254_v52 = vpop.permute.xlu1 %253 }
  0xb8   :  { %v326_v35 = vadd.f32 %v302_v34, %v301_v39  ;;  %v318_v46 = vadd.f32 %v254_v52, %v1179_v42 }
  0xb9   :  { %v252_v61 = vpop.permute.xlu0 %251 }
  0xba   :  { %v317_v47 = vadd.f32 %v252_v61, %v1180_v40  ;;  %598 = vmatmul.mubr.msk.f32.gmra.mrb[6].mxu0 %vm336_vm0, %v326_v35 }
  0xbc   :  { %v334_v43 = vadd.f32 %v318_v46, %v317_v47 }
  0xbe   :  { %610 = vmatmul.mubr.msk.f32.gmra.mrb[6].mxu1 %vm336_vm0, %v334_v43 }
 0x15d   :  { %v590_v37 = vpop.f32.mrb[0].mxu0 }
 0x15e   :  { %532 = vst.msk [vmem:[%s1154_s4 + $0x8] sm:$0xff] %vm530_vm1, %v590_v37  ;;  %v451_v24 = vpop.f32.mrb[1].mxu0 }
 0x15f   :  { %531 = vst.msk [vmem:[%s1154_s4] sm:$0xff] %vm530_vm1, %v451_v24 }
 0x161   :  { %v602_v45 = vpop.f32.mrb[0].mxu1 }
 0x162   :  { %540 = vst.msk [vmem:[%s1154_s4 + $0x48] sm:$0xff] %vm530_vm1, %v602_v45  ;;  %v491_v6 = vpop.f32.mrb[1].mxu1 }
 0x163   :  { %539 = vst.msk [vmem:[%s1154_s4 + $0x40] sm:$0xff] %vm530_vm1, %v491_v6 }
 0x16d   :  { %v593_v50 = vpop.f32.mrb[2].mxu0 }
 0x16e   :  { %534 = vst.msk [vmem:[%s1154_s4 + $0x18] sm:$0xff] %vm530_vm1, %v593_v50  ;;  %v461_v57 = vpop.f32.mrb[3].mxu0 }
 0x16f   :  { %533 = vst.msk [vmem:[%s1154_s4 + $0x10] sm:$0xff] %vm530_vm1, %v461_v57 }
 0x171   :  { %v605_v48 = vpop.f32.mrb[2].mxu1 }
 0x172   :  { %542 = vst.msk [vmem:[%s1154_s4 + $0x58] sm:$0xff] %vm530_vm1, %v605_v48  ;;  %v501_v55 = vpop.f32.mrb[3].mxu1 }
 0x173   :  { %541 = vst.msk [vmem:[%s1154_s4 + $0x50] sm:$0xff] %vm530_vm1, %v501_v55 }
 0x17d   :  { %v596_v51 = vpop.f32.mrb[4].mxu0 }
 0x17e   :  { %536 = vst.msk [vmem:[%s1154_s4 + $0x28] sm:$0xff] %vm530_vm1, %v596_v51  ;;  %v471_v58 = vpop.f32.mrb[5].mxu0 }
 0x17f   :  { %535 = vst.msk [vmem:[%s1154_s4 + $0x20] sm:$0xff] %vm530_vm1, %v471_v58 }
 0x181   :  { %v608_v62 = vpop.f32.mrb[4].mxu1 }
 0x182   :  { %544 = vst.msk [vmem:[%s1154_s4 + $0x68] sm:$0xff] %vm530_vm1, %v608_v62  ;;  %v511_v56 = vpop.f32.mrb[5].mxu1 }
 0x183   :  { %543 = vst.msk [vmem:[%s1154_s4 + $0x60] sm:$0xff] %vm530_vm1, %v511_v56 }
 0x18d   :  { %v599_v63 = vpop.f32.mrb[6].mxu0 }
 0x18e   :  { %538 = vst.msk [vmem:[%s1154_s4 + $0x38] sm:$0xff] %vm530_vm1, %v599_v63  ;;  %v481_v59 = vpop.f32.mrb[7].mxu0 }
 0x18f   :  { %537 = vst.msk [vmem:[%s1154_s4 + $0x30] sm:$0xff] %vm530_vm1, %v481_v59 }
 0x191   :  { %v611_v4 = vpop.f32.mrb[6].mxu1 }
 0x192   :  { %546 = vst.msk [vmem:[%s1154_s4 + $0x78] sm:$0xff] %vm530_vm1, %v611_v4  ;;  %v521_v54 = vpop.f32.mrb[7].mxu1 }
 0x193   :  { %545 = vst.msk [vmem:[%s1154_s4 + $0x70] sm:$0xff] %vm530_vm1, %v521_v54 }

</bundles_post_ra>
